<compile_context>
chip_gen: v7x
topology: tpu7x:2x2x1
jax: 0.10.0
libtpu: 0.0.40
codegen_flags: <defaults>
</compile_context>

<pallas_src>
import functools

import jax
import jax.numpy as jnp
from jax import lax
from jax.experimental import pallas as pl
from jax.experimental.pallas import tpu as pltpu

_LANE = 128


def _round_up(x, m):
    return (x + m - 1) // m * m


def _pad2d(a, rows, cols):
    return jnp.pad(a, ((0, rows - a.shape[0]), (0, cols - a.shape[1])))


# --------------------------------------------------------------------------
# Kernel 1: support S = X @ W   (tiled over node rows, weight resident)
# --------------------------------------------------------------------------
def support_kernel(x_ref, w_ref, s_ref):
    s_ref[...] = jnp.dot(
        x_ref[...], w_ref[...], preferred_element_type=jnp.float32
    ).astype(s_ref.dtype)


def compute_support(x, w, *, tm):
    n_p, f_in_p = x.shape
    f_out_p = w.shape[1]
    return pl.pallas_call(
        support_kernel,
        out_shape=jax.ShapeDtypeStruct((n_p, f_out_p), jnp.bfloat16),
        grid=(n_p // tm,),
        in_specs=[
            pl.BlockSpec((tm, f_in_p), lambda i: (i, 0)),
            pl.BlockSpec((f_in_p, f_out_p), lambda i: (0, 0)),  # resident weight
        ],
        out_specs=pl.BlockSpec((tm, f_out_p), lambda i: (i, 0)),
        compiler_params=pltpu.CompilerParams(
            dimension_semantics=("parallel",)),
    )(x, w)


# --------------------------------------------------------------------------
# Kernel 2: Z = activation(A @ S + b)   (tiled over (row tiles, k tiles))
# --------------------------------------------------------------------------
def aggregate_kernel(adj_ref, s_ref, b_ref, o_ref, acc_ref, *,
                     activation, n_valid_cols):
    k = pl.program_id(1)

    @pl.when(k == 0)
    def _():
        acc_ref[...] = jnp.zeros_like(acc_ref)

    acc_ref[...] += jnp.dot(
        adj_ref[...], s_ref[...], preferred_element_type=jnp.float32)

    @pl.when(k == pl.num_programs(1) - 1)
    def _():
        z = acc_ref[...] + b_ref[...]  # (1, Fp) bias broadcasts over rows
        if activation == "relu":
            o_ref[...] = jnp.maximum(z, 0.0).astype(o_ref.dtype)
        else:  # log_softmax over the valid class columns only
            col = lax.broadcasted_iota(jnp.int32, z.shape, 1)
            z = jnp.where(col < n_valid_cols, z, -jnp.inf)
            m = jnp.max(z, axis=1, keepdims=True)
            shifted = z - m
            lse = jnp.log(jnp.sum(jnp.exp(shifted), axis=1, keepdims=True))
            o_ref[...] = (shifted - lse).astype(o_ref.dtype)


def aggregate(adj, s, b2d, *, tm, tk, activation, n_valid_cols, out_dtype):
    n_p = adj.shape[0]
    f_out_p = s.shape[1]
    kernel = functools.partial(
        aggregate_kernel, activation=activation, n_valid_cols=n_valid_cols)
    return pl.pallas_call(
        kernel,
        out_shape=jax.ShapeDtypeStruct((n_p, f_out_p), out_dtype),
        grid=(n_p // tm, n_p // tk),
        in_specs=[
            pl.BlockSpec((tm, tk), lambda i, k: (i, k)),        # adj row tile
            pl.BlockSpec((tk, f_out_p), lambda i, k: (k, 0)),   # support tile
            pl.BlockSpec((1, f_out_p), lambda i, k: (0, 0)),    # resident bias
        ],
        out_specs=pl.BlockSpec((tm, f_out_p), lambda i, k: (i, 0)),
        scratch_shapes=[pltpu.VMEM((tm, f_out_p), jnp.float32)],
        compiler_params=pltpu.CompilerParams(
            dimension_semantics=("parallel", "arbitrary")),
    )(adj, s, b2d)


# --------------------------------------------------------------------------
# Full GCN forward
# --------------------------------------------------------------------------
def gcn_forward(x, adj, w1, b1, w2, b2, *, tile=None):
    n, f_in = x.shape
    hidden = w1.shape[1]
    f_out = w2.shape[1]

    # Pad feature axes to the lane width, node axis to the row-tile size.
    f_in_p = _round_up(f_in, _LANE)
    hid_p = _round_up(hidden, _LANE)
    f_out_p = _round_up(f_out, _LANE)
    if tile is None:
        tile = min(512, _round_up(n, _LANE))
    n_p = _round_up(n, tile)

    # bf16 operands for the MXU (f32 accumulation inside the kernels).
    x_p = _pad2d(x, n_p, f_in_p).astype(jnp.bfloat16)
    adj_p = _pad2d(adj, n_p, n_p).astype(jnp.bfloat16)
    w1_p = _pad2d(w1, f_in_p, hid_p).astype(jnp.bfloat16)
    w2_p = _pad2d(w2, hid_p, f_out_p).astype(jnp.bfloat16)
    b1_p = _pad2d(b1.reshape(1, -1), 1, hid_p).astype(jnp.float32)
    b2_p = _pad2d(b2.reshape(1, -1), 1, f_out_p).astype(jnp.float32)

    # --- Layer 1: H1 = relu(A @ (X @ W1) + b1) ---
    s1 = compute_support(x_p, w1_p, tm=tile)
    h1 = aggregate(adj_p, s1, b1_p, tm=tile, tk=tile,
                   activation="relu", n_valid_cols=hidden,
                   out_dtype=jnp.bfloat16)
    # TODO(synk): nn.Dropout(p=0.1) is identity in eval mode; training-mode
    #             stochastic masking is not implemented here.

    # --- Layer 2: Z = log_softmax(A @ (H1 @ W2) + b2, axis=1) ---
    s2 = compute_support(h1, w2_p, tm=tile)
    z = aggregate(adj_p, s2, b2_p, tm=tile, tk=tile,
                  activation="log_softmax", n_valid_cols=f_out,
                  out_dtype=jnp.float32)

    return z[:n, :f_out]


def reference_gcn(x, adj, w1, b1, w2, b2):
    h = jnp.maximum(adj @ (x @ w1) + b1, 0.0)
    z = adj @ (h @ w2) + b2
    return jax.nn.log_softmax(z, axis=1)


if __name__ == "__main__":
    key = jax.random.PRNGKey(0)
    N, F_IN, HIDDEN, F_OUT = 16, 32, 32, 8

    k_x, k_adj, k_w1, k_w2 = jax.random.split(key, 4)

    # Node features.
    x = jax.random.normal(k_x, (N, F_IN), dtype=jnp.float32)

    # Symmetric-normalized adjacency: D^-1/2 (A + I) D^-1/2.
    a_rand = jax.random.uniform(k_adj, (N, N), dtype=jnp.float32)
    a_bin = (a_rand > 0.7).astype(jnp.float32)
    a_sym = jnp.maximum(a_bin, a_bin.T) + jnp.eye(N, dtype=jnp.float32)
    deg = jnp.sum(a_sym, axis=1)
    d_inv_sqrt = 1.0 / jnp.sqrt(deg)
    adj = a_sym * d_inv_sqrt[:, None] * d_inv_sqrt[None, :]

    # Xavier-normal weights (deterministic), zero biases (matches module init).
    std1 = (2.0 / (F_IN + HIDDEN)) ** 0.5
    std2 = (2.0 / (HIDDEN + F_OUT)) ** 0.5
    w1 = std1 * jax.random.normal(k_w1, (F_IN, HIDDEN), dtype=jnp.float32)
    w2 = std2 * jax.random.normal(k_w2, (HIDDEN, F_OUT), dtype=jnp.float32)
    b1 = jnp.zeros((HIDDEN,), dtype=jnp.float32)
    b2 = jnp.zeros((F_OUT,), dtype=jnp.float32)

    out = gcn_forward(x, adj, w1, b1, w2, b2)
    out = jax.block_until_ready(out)

    ref = reference_gcn(x, adj, w1, b1, w2, b2)
    assert out.shape == (N, F_OUT)
    # bf16 MXU inputs with f32 accumulation -> bf16-level tolerance.
    max_err = float(jnp.max(jnp.abs(out - ref)))
    assert jnp.allclose(out, ref, atol=5e-2, rtol=5e-2), max_err

    print("KERNEL_OK")
</pallas_src>

<mosaic_0001>
module attributes {stable_mosaic.version = 11 : i64} {
  func.func @support_kernel(%arg0: i32, %arg1: memref<128x128xbf16, #tpu.memory_space<vmem>>, %arg2: memref<128x128xbf16, #tpu.memory_space<vmem>>, %arg3: memref<128x128xbf16, #tpu.memory_space<vmem>>) attributes {dimension_semantics = [#tpu.dimension_semantics<parallel>], iteration_bounds = array<i64: 1>, scalar_prefetch = 0 : i64, scratch_operands = 0 : i64, tpu.core_type = #tpu.core_type<tc>, window_params = [{transform_indices = @transform_0, window_bounds = array<i64: 128, 128>}, {pipeline_mode = #tpu.pipeline_mode<synchronous>, transform_indices = @transform_1, window_bounds = array<i64: 128, 128>}, {transform_indices = @transform_2, window_bounds = array<i64: 128, 128>}]} {
    %c0 = arith.constant 0 : index
    %c0_0 = arith.constant 0 : index
    %0 = vector.load %arg1[%c0, %c0_0] : memref<128x128xbf16, #tpu.memory_space<vmem>>, vector<128x128xbf16>
    %c0_1 = arith.constant 0 : index
    %c0_2 = arith.constant 0 : index
    %1 = vector.load %arg2[%c0_1, %c0_2] : memref<128x128xbf16, #tpu.memory_space<vmem>>, vector<128x128xbf16>
    %cst = arith.constant dense<0.000000e+00> : vector<128x128xf32>
    %2 = tpu.matmul %0, %1, %cst {dimension_numbers = #tpu.dot_dimension_numbers<[1], [0], [0], [1], [0, 0, 1, 1], [], []>} : vector<128x128xbf16>, vector<128x128xbf16>, vector<128x128xf32> -> vector<128x128xf32>
    %3 = arith.truncf %2 : vector<128x128xf32> to vector<128x128xbf16>
    %c0_3 = arith.constant 0 : index
    %c0_4 = arith.constant 0 : index
    %4 = vector.load %arg3[%c0_3, %c0_4] : memref<128x128xbf16, #tpu.memory_space<vmem>>, vector<128x128xbf16>
    tpu.vector_store %arg3[%c0_3, %c0_4], %3 {strides = array<i32>} : memref<128x128xbf16, #tpu.memory_space<vmem>>, vector<128x128xbf16>,
    return
  }
  func.func @transform_0(%arg0: i32) -> (i32, i32) {
    %c0_i32 = arith.constant 0 : i32
    %c0_i32_0 = arith.constant 0 : i32
    return %arg0, %c0_i32 : i32, i32
  }
  func.func @transform_1(%arg0: i32) -> (i32, i32) {
    %c0_i32 = arith.constant 0 : i32
    %c0_i32_0 = arith.constant 0 : i32
    %c0_i32_1 = arith.constant 0 : i32
    return %c0_i32, %c0_i32_0 : i32, i32
  }
  func.func @transform_2(%arg0: i32) -> (i32, i32) {
    %c0_i32 = arith.constant 0 : i32
    %c0_i32_0 = arith.constant 0 : i32
    return %arg0, %c0_i32 : i32, i32
  }
}

</mosaic_0001>

<bundles_post_ra>
// kernel: tpu_custom_call.1
= control target key start
LH: loop header
LB: loop body
LE: loop exit
PB: predicated region body
PF: predicated region fallthrough
CT: control target
= control target key end

     0   :  { %7 = vsyncpa [#allocation3], 0  ;;  %s681_s0 = inlined_call_operand.hbm [shape: bf16[128,128], index: 0, kind: input, shape index: {}]   ;;  %s682_s1 = inlined_call_operand.hbm [shape: bf16[128,128], index: 1, kind: input, shape index: {}]   ;;  %s683_s2 = inlined_call_operand.hbm [shape: bf16[128,128], index: 2, kind: output, shape index: {}]  }
   0x1   :  { %8 = vsyncpa [#allocation6], 0 }
   0x2   :  { %9 = vsyncpa [#allocation4], 0  ;;  %s616_s9 = smov [#allocation2]   ;;  %s544_s13 = scalar_lea.hbm %s681_s0, 1024 }
   0x3   :  { %s15_s10 = sshll.u32 %s616_s9, 4  ;;  %p545_p0 = scmp.ne.s32.totalorder %s681_s0, %s544_s13  ;;  %s16_s10 = int_to_ptr.vmem [resolvable:$true] %s15_s10 }
   0x4   :  { %p548_p1 = scmp.lt.u32.totalorder %s544_s13, %s681_s0 }
   0x6   :  { %p550_p2 = pnand %p548_p1, %p545_p0 }
   0x8   :  { %553 = shalt.err (!%p550_p2)
}
   0x9   :  { %s554_s18 = scalar_lea.vmem %s16_s10, 1024  ;;  %p559_p4 = scmp.lt.s32.totalorder %s16_s10, %s16_s10 }
   0xa   :  { %p555_p3 = scmp.ne.s32.totalorder %s16_s10, %s554_s18  ;;  %p560_p5 = scmp.lt.s32.totalorder %s554_s18, %s554_s18 }
   0xc   :  { %p561_p6 = por %p560_p5, %p559_p4 }
   0xe   :  { %p562_p7 = pnand %p561_p6, %p555_p3 }
  0x10   :  { %565 = shalt.err (!%p562_p7)
}
  0x11   :  { %s617_s19 = smov 64   ;;  %s618_s20 = smov 4  }
  0x12   :  { %21 = dma.hbm_to_vmem [thread:$0]  %s681_s0, 1024, %s16_s10, [#allocation3], %s617_s19, %s617_s19, %s618_s20  }
  0x13   :  { %s619_s23 = smov [#allocation5]   ;;  %s566_s27 = scalar_lea.hbm %s682_s1, 1024 }
  0x14   :  { %s27_s24 = sshll.u32 %s619_s23, 4  ;;  %p567_p8 = scmp.ne.s32.totalorder %s682_s1, %s566_s27  ;;  %s28_s24 = int_to_ptr.vmem [resolvable:$true] %s27_s24 }
  0x15   :  { %p570_p9 = scmp.lt.u32.totalorder %s566_s27, %s682_s1 }
  0x17   :  { %p572_p10 = pnand %p570_p9, %p567_p8 }
  0x19   :  { %575 = shalt.err (!%p572_p10)
}
  0x1a   :  { %s576_s4 = scalar_lea.vmem %s28_s24, 1024  ;;  %p581_p12 = scmp.lt.s32.totalorder %s28_s24, %s28_s24 }
  0x1b   :  { %p577_p11 = scmp.ne.s32.totalorder %s28_s24, %s576_s4  ;;  %p582_p13 = scmp.lt.s32.totalorder %s576_s4, %s576_s4 }
  0x1d   :  { %p583_p0 = por %p582_p13, %p581_p12 }
  0x1f   :  { %p584_p1 = pnand %p583_p0, %p577_p11 }
  0x21   :  { %587 = shalt.err (!%p584_p1)
}
  0x22   :  { %33 = dma.hbm_to_vmem [thread:$0]  %s682_s1, 1024, %s28_s24, [#allocation6], %s617_s19, %s617_s19, %s618_s20  }
  0x23   :  { %610 = dma.done.wait [#allocation3], 1024  }
  0x24   :  { %611 = vsyncadd [#allocation3], 4294966272 }
  0x25   :  { %612 = dma.done.wait [#allocation6], 1024  }
  0x26   :  { %613 = vsyncadd [#allocation6], 4294966272  ;;  %v528_v0 = vld [vmem:[#allocation5] sm:$0xff]   ;;  %v529_v1 = vld [vmem:[#allocation5 + $0x8] sm:$0xff]   ;;  %s620_s1 = smov [#allocation7]  }
  0x27   :  { %475 = vmatprep.subr.bf16.mxu0 %v528_v0  ;;  %507 = vmatprep.subr.bf16.mxu1 %v528_v0  ;;  %v530_v2 = vld [vmem:[#allocation5 + $0x10] sm:$0xff]   ;;  %v531_v3 = vld [vmem:[#allocation5 + $0x18] sm:$0xff]   ;;  %v536_v4 = vld [vmem:[#allocation2] sm:$0xff]   ;;  %s351_s6 = sshll.u32 %s620_s1, 4  ;;  %s352_s6 = int_to_ptr.vmem [resolvable:$true] %s351_s6 }
  0x28   :  { %476 = vmatpush3.bf16.msra.mxu0 %v528_v0  ;;  %515 = vmatpush3.bf16.msra.mxu1 %v528_v0  ;;  %v537_v5 = vld [vmem:[#allocation2 + $0x20] sm:$0xff]   ;;  %v533_v7 = vld [vmem:[#allocation5 + $0x28] sm:$0xff]   ;;  %v534_v8 = vld [vmem:[#allocation5 + $0x30] sm:$0xff]   ;;  %s588_s7 = scalar_lea.vmem %s352_s6, 1024  ;;  %p593_p3 = scmp.lt.s32.totalorder %s352_s6, %s352_s6 }
  0x29   :  { %477 = vmatprep.subr.bf16.mxu0 %v529_v1  ;;  %508 = vmatprep.subr.bf16.mxu1 %v529_v1  ;;  %v532_v6 = vld [vmem:[#allocation5 + $0x20] sm:$0xff]   ;;  %v535_v9 = vld [vmem:[#allocation5 + $0x38] sm:$0xff]   ;;  %v538_v10 = vld [vmem:[#allocation2 + $0x8] sm:$0xff]   ;;  %p589_p2 = scmp.ne.s32.totalorder %s352_s6, %s588_s7  ;;  %p594_p4 = scmp.lt.s32.totalorder %s588_s7, %s588_s7 }
  0x2a   :  { %491 = vmatprep.mubr.bf16.mxu0 %v536_v4  ;;  %499 = vmatprep.mubr.bf16.mxu1 %v537_v5  ;;  %v539_v11 = vld [vmem:[#allocation2 + $0x28] sm:$0xff]   ;;  %v540_v12 = vld [vmem:[#allocation2 + $0x10] sm:$0xff]   ;;  %v542_v14 = vld [vmem:[#allocation2 + $0x18] sm:$0xff]  }
  0x2b   :  { %v541_v13 = vld [vmem:[#allocation2 + $0x30] sm:$0xff]   ;;  %v543_v15 = vld [vmem:[#allocation2 + $0x38] sm:$0xff]   ;;  %p595_p5 = por %p594_p4, %p593_p3 }
  0x2c   :  { %478 = vmatpush3.bf16.msra.mxu0 %v529_v1  ;;  %516 = vmatpush3.bf16.msra.mxu1 %v529_v1 }
  0x2d   :  { %479 = vmatprep.subr.bf16.mxu0 %v530_v2  ;;  %509 = vmatprep.subr.bf16.mxu1 %v530_v2  ;;  %p596_p6 = pnand %p595_p5, %p589_p2 }
  0x30   :  { %480 = vmatpush3.bf16.msra.mxu0 %v530_v2  ;;  %517 = vmatpush3.bf16.msra.mxu1 %v530_v2 }
  0x31   :  { %481 = vmatprep.subr.bf16.mxu0 %v531_v3  ;;  %510 = vmatprep.subr.bf16.mxu1 %v531_v3 }
  0x34   :  { %482 = vmatpush3.bf16.msra.mxu0 %v531_v3  ;;  %518 = vmatpush3.bf16.msra.mxu1 %v531_v3 }
  0x35   :  { %483 = vmatprep.subr.bf16.mxu0 %v532_v6  ;;  %511 = vmatprep.subr.bf16.mxu1 %v532_v6 }
  0x38   :  { %484 = vmatpush3.bf16.msra.mxu0 %v532_v6  ;;  %519 = vmatpush3.bf16.msra.mxu1 %v532_v6 }
  0x39   :  { %485 = vmatprep.subr.bf16.mxu0 %v533_v7  ;;  %512 = vmatprep.subr.bf16.mxu1 %v533_v7 }
  0x3c   :  { %486 = vmatpush3.bf16.msra.mxu0 %v533_v7  ;;  %520 = vmatpush3.bf16.msra.mxu1 %v533_v7 }
  0x3d   :  { %487 = vmatprep.subr.bf16.mxu0 %v534_v8  ;;  %513 = vmatprep.subr.bf16.mxu1 %v534_v8 }
  0x40   :  { %488 = vmatpush3.bf16.msra.mxu0 %v534_v8  ;;  %521 = vmatpush3.bf16.msra.mxu1 %v534_v8 }
  0x41   :  { %489 = vmatprep.subr.bf16.mxu0 %v535_v9  ;;  %514 = vmatprep.subr.bf16.mxu1 %v535_v9 }
  0x44   :  { %490 = vmatpush3.bf16.msra.mxu0 %v535_v9  ;;  %522 = vmatpush3.bf16.msra.mxu1 %v535_v9 }
  0x47   :  { %492 = vmatmul.mubr.bf16.vlgmr.msra.gmra.mrb[0].mxu0 %v538_v10  ;;  %500 = vmatmul.mubr.bf16.vlgmr.msra.gmra.mrb[0].mxu1 %v539_v11 }
  0x48   :  { %495 = vmatprep.mubr.bf16.mxu0 %v540_v12  ;;  %503 = vmatprep.mubr.bf16.mxu1 %v541_v13 }
  0x4f   :  { %496 = vmatmul.mubr.bf16.gmra.mrb[4].mxu0 %v542_v14  ;;  %504 = vmatmul.mubr.bf16.gmra.mrb[4].mxu1 %v543_v15 }
 0x11a   :  { %v493_v16 = vpop.f32.mrb[0].mxu0  ;;  %v501_v17 = vpop.f32.mrb[0].mxu1 }
 0x11b   :  { %v203_v18 = vpop.f32.mrb[1].mxu0  ;;  %v235_v19 = vpop.f32.mrb[1].mxu1 }
 0x11c   :  { %v494_v20 = vpop.f32.mrb[2].mxu0  ;;  %v502_v21 = vpop.f32.mrb[2].mxu1 }
 0x11d   :  { %v420_v22 = vpack.c.bf16 %v494_v20, %v493_v16  ;;  %v440_v23 = vpack.c.bf16 %v502_v21, %v501_v17  ;;  %v206_v24 = vpop.f32.mrb[3].mxu0  ;;  %v238_v25 = vpop.f32.mrb[3].mxu1 }
 0x11e   :  { %v415_v26 = vpack.c.bf16 %v206_v24, %v203_v18  ;;  %v435_v27 = vpack.c.bf16 %v238_v25, %v235_v19 }
 0x11f   :  { %452 = vst [vmem:[#allocation7 + $0x8] sm:$0xff] %v420_v22   ;;  %456 = vst [vmem:[#allocation7 + $0x28] sm:$0xff] %v440_v23  }
 0x120   :  { %416 = vst [vmem:[#allocation7] sm:$0xff] %v415_v26   ;;  %455 = vst [vmem:[#allocation7 + $0x20] sm:$0xff] %v435_v27  }
 0x122   :  { %v497_v28 = vpop.f32.mrb[4].mxu0  ;;  %v505_v29 = vpop.f32.mrb[4].mxu1 }
 0x123   :  { %v219_v30 = vpop.f32.mrb[5].mxu0  ;;  %v251_v31 = vpop.f32.mrb[5].mxu1 }
 0x124   :  { %v498_v32 = vpop.f32.mrb[6].mxu0  ;;  %v506_v33 = vpop.f32.mrb[6].mxu1 }
 0x125   :  { %v430_v34 = vpack.c.bf16 %v498_v32, %v497_v28  ;;  %v450_v35 = vpack.c.bf16 %v506_v33, %v505_v29  ;;  %v222_v36 = vpop.f32.mrb[7].mxu0  ;;  %v254_v37 = vpop.f32.mrb[7].mxu1 }
 0x126   :  { %v425_v38 = vpack.c.bf16 %v222_v36, %v219_v30  ;;  %v445_v39 = vpack.c.bf16 %v254_v37, %v251_v31 }
 0x127   :  { %454 = vst [vmem:[#allocation7 + $0x18] sm:$0xff] %v430_v34   ;;  %458 = vst [vmem:[#allocation7 + $0x38] sm:$0xff] %v450_v35  }
 0x128   :  { %453 = vst [vmem:[#allocation7 + $0x10] sm:$0xff] %v425_v38   ;;  %457 = vst [vmem:[#allocation7 + $0x30] sm:$0xff] %v445_v39  }
 0x129   :  { %599 = shalt.err (!%p596_p6)
}
 0x12a   :  { %s600_s10 = scalar_lea.hbm %s683_s2, 1024 }
 0x12b   :  { %p601_p7 = scmp.ne.s32.totalorder %s683_s2, %s600_s10  ;;  %p604_p8 = scmp.lt.u32.totalorder %s600_s10, %s683_s2 }
 0x12d   :  { %p606_p9 = pnand %p604_p8, %p601_p7 }
 0x12f   :  { %609 = shalt.err (!%p606_p9)
}
 0x130   :  { %357 = dma.vmem_to_hbm [thread:$0]  %s352_s6, 1024, %s683_s2, [#allocation4], %s617_s19, %s617_s19, %s618_s20  }
 0x131   :  { %614 = dma.done.wait [#allocation4], 1024  }
 0x132   :  { %615 = vsyncadd [#allocation4], 4294966272 }
 0x133   :  { %361 = vsyncpa [#allocation3], 1 }
 0x134   :  { %362 = vsyncpa [#allocation6], 1 }
 0x135   :  { %363 = vsyncpa [#allocation4], 1 }

</bundles_post_ra>
